<compile_context>
chip_gen: v6e
topology: v6e:2x2x1
jax: 0.10.0
libtpu: 0.0.40
codegen_flags: <defaults>
</compile_context>

<pallas_src>
import functools

import jax
import jax.numpy as jnp
from jax import lax
from jax.experimental import pallas as pl
from jax.experimental.pallas import tpu as pltpu


def _cdiv(a, b):
    return -(-a // b)


def _round_up(n, m):
    return _cdiv(n, m) * m


def _sublane_pack(itemsize):
    # sublane packing: 8 rows for f32, 16 for bf16, 32 for int8/fp8
    return max(8, 32 // int(itemsize))


def _vmem_capacity_bytes():
    try:
        cap = getattr(pltpu.get_tpu_info(), "vmem_capacity_bytes", None)
        if cap:
            return int(cap)
    except Exception:
        pass
    # Conservative fallback (smallest current generation, v7x per-TC).
    return 64 << 20


def _target_tile_bytes(vmem_cap):
    # ~4 MiB per (tm, dim) tile on 64 MiB-VMEM parts (v7x), ~8 MiB on
    # 128 MiB parts (v5e/v6e); measured elementwise roofline plateau is
    # reached well below this, so it mainly amortizes ~0.35 us/step overhead.
    return int(min(8 << 20, max(2 << 20, vmem_cap // 16)))


def _choose_row_tile(rows, dim, itemsize, target_bytes):
    pack = _sublane_pack(itemsize)
    row_bytes = max(1, dim * itemsize)
    # Byte-based cap (no hard 1024-row cap); allow up to 8192 rows for small
    # feature dims so the tile stays on the HBM-roofline plateau.
    tm = (target_bytes // row_bytes) // pack * pack
    tm = max(pack, min(tm, 8192))
    if rows <= tm:
        # Single block covering the full array (always a legal block shape).
        return rows
    # Few-tile regime: make the step count even so v7x's two TensorCores get
    # balanced work on the "parallel" grid axis (harmless on 1-TC chips).
    steps = _cdiv(rows, tm)
    if steps < 8 and steps % 2 == 1:
        tm_even = _round_up(_cdiv(rows, steps + 1), pack)
        if tm_even >= pack and tm_even < rows and _cdiv(rows, tm_even) % 2 == 0:
            tm = tm_even
    return tm


def _vmem_limit_bytes(tm, dim, itemsize, vmem_cap):
    tile = tm * dim
    # 2x double-buffered input tile + 2x double-buffered output tile (input
    # dtype) + ~2 f32 tile-sized temporaries, plus generous headroom so
    # Mosaic pipeline scratch / extra temporaries never hit the limit.
    need = tile * (4 * itemsize + 2 * 4) + (16 << 20)
    clamp = min(96 << 20, (vmem_cap * 3) // 4)   # 48 MiB on v7x, 96 MiB on v5e/v6e
    return int(min(max(need, 32 << 20), clamp))


def _rmsnorm_kernel(x_ref, w_ref, o_ref, *, eps, inv_dim):
    # x_ref: (tm, dim) tile of rows; w_ref: (1, dim) f32 weight
    # (constant index_map -> resident across the whole grid).
    xf = x_ref[...].astype(jnp.float32)
    sumsq = jnp.sum(xf * xf, axis=-1, keepdims=True)           # (tm, 1)
    inv = lax.rsqrt(sumsq * inv_dim + eps)                     # (tm, 1)
    # Re-read/upcast x for the scaled output instead of keeping xf live
    # across the reduction: trades cheap vld/cast slots (plentiful, the
    # kernel is DMA-bound) for a smaller f32 VMEM footprint.
    o_ref[...] = (x_ref[...].astype(jnp.float32) * inv * w_ref[...]).astype(o_ref.dtype)


def rmsnorm(x, weight, *, eps=1e-6, row_tile=None):
    """x: (..., dim) array, weight: (dim,). Returns same shape/dtype as x."""
    orig_shape = x.shape
    dim = orig_shape[-1]
    rows = 1
    for s in orig_shape[:-1]:
        rows *= s
    x2d = x.reshape(rows, dim)

    itemsize = jnp.dtype(x.dtype).itemsize
    pack = _sublane_pack(itemsize)
    vmem_cap = _vmem_capacity_bytes()

    if row_tile is None:
        tm = _choose_row_tile(rows, dim, itemsize, _target_tile_bytes(vmem_cap))
    else:
        tm = min(rows, max(pack, _round_up(int(row_tile), pack)))

    # Hoist the weight cast: f32 once in the wrapper, not once per grid step.
    w2d = weight.astype(jnp.float32).reshape(1, dim)

    # Ragged rows handled by cdiv grid: the last block is clipped by Pallas,
    # out-of-bounds rows are computed on garbage but never stored.
    # Last block dim == true dim (always legal); for dim < 128 this is a
    # lane-sparse layout with masked partial stores -> slow for tiny dims.
    grid = (pl.cdiv(rows, tm),)

    out = pl.pallas_call(
        functools.partial(_rmsnorm_kernel, eps=float(eps), inv_dim=1.0 / float(dim)),
        out_shape=jax.ShapeDtypeStruct((rows, dim), x.dtype),
        grid_spec=pltpu.PrefetchScalarGridSpec(
            num_scalar_prefetch=0,
            grid=grid,
            in_specs=[
                pl.BlockSpec((tm, dim), lambda i: (i, 0)),
                pl.BlockSpec((1, dim), lambda i: (0, 0)),
            ],
            out_specs=pl.BlockSpec((tm, dim), lambda i: (i, 0)),
        ),
        compiler_params=pltpu.CompilerParams(
            dimension_semantics=("parallel",),
            vmem_limit_bytes=_vmem_limit_bytes(tm, dim, itemsize, vmem_cap),
        ),
    )(x2d, w2d)

    return out.reshape(orig_shape)


if __name__ == "__main__":
    key = jax.random.PRNGKey(0)
    batch, seq, dim = 2, 8, 32
    eps = 1e-6

    x = jax.random.normal(key, (batch, seq, dim), dtype=jnp.float32)
    # Deterministic parameter init matching nn.Parameter(torch.ones(dim))
    weight = jnp.ones((dim,), dtype=jnp.float32)

    y = rmsnorm(x, weight, eps=eps)
    y = jax.block_until_ready(y)

    # Reference check in plain JAX
    ref = x * lax.rsqrt(jnp.mean(x * x, axis=-1, keepdims=True) + eps) * weight
    assert y.shape == x.shape and y.dtype == x.dtype
    assert jnp.allclose(y, ref, atol=1e-5, rtol=1e-5)

    # Also exercise a ragged, multi-tile path (rows not divisible by the tile,
    # dim not a multiple of 128) to validate the cdiv/clipped-block handling.
    x2 = jax.random.normal(jax.random.PRNGKey(1), (3, 13, 160), dtype=jnp.float32)
    w2 = jax.random.normal(jax.random.PRNGKey(2), (160,), dtype=jnp.float32)
    y2 = jax.block_until_ready(rmsnorm(x2, w2, eps=eps, row_tile=16))
    ref2 = x2 * lax.rsqrt(jnp.mean(x2 * x2, axis=-1, keepdims=True) + eps) * w2
    assert jnp.allclose(y2, ref2, atol=1e-5, rtol=1e-5)

    print("KERNEL_OK")
</pallas_src>

<mosaic_0001>
module attributes {stable_mosaic.version = 11 : i64} {
  func.func @_rmsnorm_kernel(%arg0: i32, %arg1: memref<16x32xf32, #tpu.memory_space<vmem>>, %arg2: memref<1x32xf32, #tpu.memory_space<vmem>>, %arg3: memref<16x32xf32, #tpu.memory_space<vmem>>) attributes {dimension_semantics = [#tpu.dimension_semantics<parallel>], iteration_bounds = array<i64: 1>, scalar_prefetch = 0 : i64, scratch_operands = 0 : i64, tpu.core_type = #tpu.core_type<tc>, window_params = [{transform_indices = @transform_0, window_bounds = array<i64: 16, 32>}, {pipeline_mode = #tpu.pipeline_mode<synchronous>, transform_indices = @transform_1, window_bounds = array<i64: 1, 32>}, {transform_indices = @transform_2, window_bounds = array<i64: 16, 32>}]} {
    %c0 = arith.constant 0 : index
    %c0_0 = arith.constant 0 : index
    %0 = vector.load %arg1[%c0, %c0_0] : memref<16x32xf32, #tpu.memory_space<vmem>>, vector<16x32xf32>
    %1 = arith.mulf %0, %0 : vector<16x32xf32>
    %cst = arith.constant dense<0.000000e+00> : vector<16xf32>
    %2 = vector.multi_reduction <add>, %1, %cst [1] : vector<16x32xf32> to vector<16xf32>
    %3 = vector.shape_cast %2 : vector<16xf32> to vector<16x1xf32>
    %cst_1 = arith.constant 3.125000e-02 : f32
    %4 = vector.broadcast %cst_1 : f32 to vector<16x1xf32>
    %5 = arith.mulf %3, %4 : vector<16x1xf32>
    %cst_2 = arith.constant 9.99999997E-7 : f32
    %6 = vector.broadcast %cst_2 : f32 to vector<16x1xf32>
    %7 = arith.addf %5, %6 : vector<16x1xf32>
    %8 = math.rsqrt %7 : vector<16x1xf32>
    %c0_3 = arith.constant 0 : index
    %c0_4 = arith.constant 0 : index
    %9 = vector.load %arg1[%c0_3, %c0_4] : memref<16x32xf32, #tpu.memory_space<vmem>>, vector<16x32xf32>
    %10 = vector.broadcast %8 : vector<16x1xf32> to vector<16x32xf32>
    %11 = arith.mulf %9, %10 : vector<16x32xf32>
    %c0_5 = arith.constant 0 : index
    %c0_6 = arith.constant 0 : index
    %12 = vector.load %arg2[%c0_5, %c0_6] : memref<1x32xf32, #tpu.memory_space<vmem>>, vector<1x32xf32>
    %13 = vector.broadcast %12 : vector<1x32xf32> to vector<16x32xf32>
    %14 = arith.mulf %11, %13 : vector<16x32xf32>
    %c0_7 = arith.constant 0 : index
    %c0_8 = arith.constant 0 : index
    %15 = vector.load %arg3[%c0_7, %c0_8] : memref<16x32xf32, #tpu.memory_space<vmem>>, vector<16x32xf32>
    tpu.vector_store %arg3[%c0_7, %c0_8], %14 {strides = array<i32>} : memref<16x32xf32, #tpu.memory_space<vmem>>, vector<16x32xf32>,
    return
  }
  func.func @transform_0(%arg0: i32) -> (i32, i32) {
    %c0_i32 = arith.constant 0 : i32
    %c0_i32_0 = arith.constant 0 : i32
    return %arg0, %c0_i32 : i32, i32
  }
  func.func @transform_1(%arg0: i32) -> (i32, i32) {
    %c0_i32 = arith.constant 0 : i32
    %c0_i32_0 = arith.constant 0 : i32
    %c0_i32_1 = arith.constant 0 : i32
    return %c0_i32, %c0_i32_0 : i32, i32
  }
  func.func @transform_2(%arg0: i32) -> (i32, i32) {
    %c0_i32 = arith.constant 0 : i32
    %c0_i32_0 = arith.constant 0 : i32
    return %arg0, %c0_i32 : i32, i32
  }
}

</mosaic_0001>

<bundles_post_ra>
// kernel: tpu_custom_call.1
= control target key start
LH: loop header
LB: loop body
LE: loop exit
PB: predicated region body
PF: predicated region fallthrough
CT: control target
= control target key end

     0   :  { %7 = vsyncpa [#allocation3], 0  ;;  %s164_s0 = inlined_call_operand.hbm [shape: f32[16,32], index: 0, kind: input, shape index: {}]   ;;  %s165_s1 = inlined_call_operand.vmem [shape: f32[1,32], index: 1, kind: input, shape index: {}]   ;;  %s166_s2 = inlined_call_operand.hbm [shape: f32[16,32], index: 2, kind: output, shape index: {}]  }
   0x1   :  { %8 = vsyncpa [#allocation4], 0  ;;  %s126_s9 = smov [#allocation2]  }
   0x2   :  { %s14_s10 = sshll.u32 %s126_s9, 4  ;;  %s15_s10 = int_to_ptr.vmem [resolvable:$true] %s14_s10 }
   0x3   :  { %s90_s11 = scalar_lea.vmem %s15_s10, 256  ;;  %p95_p1 = scmp.lt.s32.totalorder %s15_s10, %s15_s10 }
   0x4   :  { %p91_p0 = scmp.ne.s32.totalorder %s15_s10, %s90_s11  ;;  %p96_p2 = scmp.lt.s32.totalorder %s90_s11, %s90_s11 }
   0x6   :  { %p97_p3 = por %p96_p2, %p95_p1 }
   0x8   :  { %p98_p4 = pnand %p97_p3, %p91_p0 }
   0xa   :  { %101 = shalt.err (!%p98_p4)
}
   0xb   :  { %s127_s12 = smov 128   ;;  %s128_s13 = smov 8  }
   0xc   :  { %20 = dma.hbm_to_vmem [thread:$0]  %s164_s0, 256, %s15_s10, [#allocation3], %s127_s12, %s127_s12, %s128_s13  }
   0xd   :  { %122 = dma.done.wait [#allocation3], 256  }
   0xe   :  { %123 = vsyncadd [#allocation3], 4294967040  ;;  %v26_v0 = vld [vmem:[#allocation2] sm:$0xff]  ;;  %vm30_vm0 = vcmask 261120   ;;  %v27_v1 = vld [vmem:[#allocation2 + $0x8] sm:$0xff]  ;;  %s129_s17 = smov [#allocation5]  }
   0xf   :  { %v28_v2 = vmul.f32 %v26_v0, %v26_v0  ;;  %v29_v3 = vmul.f32 %v27_v1, %v27_v1  ;;  %v73_v13 = vld [vmem:[%s165_s1] ss:$0 sm:$0xff]  ;;  %s61_s18 = sshll.u32 %s129_s17, 4  ;;  %s62_s18 = int_to_ptr.vmem [resolvable:$true] %s61_s18 }
  0x10   :  { %s102_s19 = scalar_lea.vmem %s62_s18, 256  ;;  %p107_p6 = scmp.lt.s32.totalorder %s62_s18, %s62_s18 }
  0x11   :  { %v31_v4 = vsel %vm30_vm0, %v28_v2, 0.0  ;;  %v34_v5 = vsel %vm30_vm0, %v29_v3, 0.0  ;;  %p103_p5 = scmp.ne.s32.totalorder %s62_s18, %s102_s19  ;;  %p108_p7 = scmp.lt.s32.totalorder %s102_s19, %s102_s19 }
  0x12   :  { %32 = vadd.xlane.f32.xlu0 %v31_v4 }
  0x13   :  { %p109_p8 = por %p108_p7, %p107_p6 }
  0x15   :  { %p110_p9 = pnand %p109_p8, %p103_p5 }
  0x16   :  { %35 = vadd.xlane.f32.xlu0 %v34_v5 }
  0x9b   :  { %v33_v6 = vpop.xlane.xlu0 %32 }
  0x9c   :  { %v37_v7 = vmul.f32 0.03125, %v33_v6 }
  0x9e   :  { %v39_v8 = vadd.f32 1e-06, %v37_v7 }
  0x9f   :  { %v36_v9 = vpop.xlane.xlu0 %35 }
  0xa0   :  { %78 = vrsqrt.f32 %v39_v8  ;;  %v38_v10 = vmul.f32 0.03125, %v36_v9 }
  0xa2   :  { %v40_v11 = vadd.f32 1e-06, %v38_v10 }
  0xa4   :  { %80 = vrsqrt.f32 %v40_v11 }
  0xad   :  { %v79_v12 = vpop.eup %78 }
  0xae   :  { %v43_v14 = vmul.f32 %v79_v12, %v26_v0 }
  0xb0   :  { %v52_v15 = vmul.f32 %v73_v13, %v43_v14 }
  0xb1   :  { %v81_v16 = vpop.eup %80 }
  0xb2   :  { %v44_v17 = vmul.f32 %v81_v16, %v27_v1  ;;  %54 = vst.msk [vmem:[#allocation5] sm:$0xff] %vm30_vm0, %v52_v15 }
  0xb4   :  { %v53_v18 = vmul.f32 %v73_v13, %v44_v17 }
  0xb6   :  { %55 = vst.msk [vmem:[#allocation5 + $0x8] sm:$0xff] %vm30_vm0, %v53_v18 }
  0xb7   :  { %113 = shalt.err (!%p110_p9)
}
  0xb8   :  { %67 = dma.vmem_to_hbm [thread:$0]  %s62_s18, 256, %s166_s2, [#allocation4], %s127_s12, %s127_s12, %s128_s13  }
  0xb9   :  { %124 = dma.done.wait [#allocation4], 256  }
  0xba   :  { %125 = vsyncadd [#allocation4], 4294967040 }
  0xbb   :  { %71 = vsyncpa [#allocation3], 1 }
  0xbc   :  { %72 = vsyncpa [#allocation4], 1 }

</bundles_post_ra>
